<compile_context>
chip_gen: v7x
topology: tpu7x:2x2x1
jax: 0.10.0
libtpu: 0.0.40
codegen_flags: <defaults>
</compile_context>

<pallas_src>
import functools

import jax
import jax.numpy as jnp
from jax import lax
from jax.experimental import pallas as pl
from jax.experimental.pallas import tpu as pltpu

BN_EPS = 1e-5


def _round_up(x, m):
    return ((x + m - 1) // m) * m


def _vq_kernel(x_ref, wd_ref, cd_ref, we_ref, b2_ref,
               quant_ref, part_ref, *, n_valid, tile_n, k_pad):
    x = x_ref[...]                                    # [TN, D_in] f32

    # ---- fused BN1 -> dropout(id) -> linear1 -> -2*(h @ emb.T) + const -----
    # dist = ||e||^2 - 2*<h, e>  (the ||h||^2 term is argmin-invariant).
    dist = jnp.dot(x, wd_ref[...],
                   preferred_element_type=jnp.float32) + cd_ref[...]   # [TN, K_pad]

    # ---- argmin (first occurrence) + one-hot encodings ---------------------
    col_ids = lax.broadcasted_iota(jnp.int32, dist.shape, 1)           # [TN, K_pad]
    min_d = jnp.min(dist, axis=1, keepdims=True)                       # [TN, 1]
    masked = jnp.where(dist == min_d, col_ids, k_pad)                  # first min wins
    argmin = jnp.min(masked, axis=1, keepdims=True)                    # [TN, 1]
    enc = (col_ids == argmin).astype(jnp.float32)                      # [TN, K_pad]

    # ---- fused (enc @ emb) -> BN2 -> dropout(id) -> linear2 -----------------
    q = jnp.dot(enc, we_ref[...],
                preferred_element_type=jnp.float32) + b2_ref[...]      # [TN, D_in]
    quant_ref[...] = q          # forward value of inputs + (q - inputs).detach()

    # ---- per-tile partial reductions (valid rows only), one lane-dense block
    row = pl.program_id(0) * tile_n + lax.broadcasted_iota(
        jnp.int32, (x.shape[0], 1), 0)                                 # [TN, 1]
    valid = (row < n_valid).astype(jnp.float32)                        # [TN, 1]

    usage_row = jnp.sum(enc * valid, axis=0, keepdims=True)            # [1, K_pad]
    se_col = jnp.sum(((q - x) ** 2) * valid, axis=1, keepdims=True)    # [TN, 1]
    se_val = jnp.sum(se_col, axis=0, keepdims=True)                    # [1, 1]
    se_row = jnp.where(
        lax.broadcasted_iota(jnp.int32, (1, 128), 1) == 0, se_val, 0.0)  # [1, 128]

    part_ref[...] = jnp.concatenate([usage_row, se_row], axis=1)[None]  # [1,1,K_pad+128]


def vector_quantizer_forward(inputs, params, *, commitment_cost, tile_n=1024):
    """Pallas forward. Returns (loss, quantized, usage, codebook)."""
    emb, w1, b1, w2, b2 = params
    input_shape = inputs.shape
    input_dim = w1.shape[0]
    embedding_dim = emb.shape[1]
    num_embeddings = emb.shape[0]

    flat = inputs.reshape(-1, input_dim).astype(jnp.float32)
    n = flat.shape[0]

    # --- tile N (multiple of 8 sublanes); keep >= 2 grid steps for v7x's two
    # TensorCores; pad N so every tile is full. -------------------------------
    tn = max(8, min(tile_n, _round_up(n, 8)))
    if n > 8:
        tn = min(tn, max(8, _round_up(pl.cdiv(n, 2), 8)))
    grid_n = pl.cdiv(n, tn)
    n_pad = grid_n * tn
    if n_pad != n:
        flat = jnp.pad(flat, ((0, n_pad - n), (0, 0)))

    # --- pad codebook size K to a multiple of 128 lanes ----------------------
    k_pad = _round_up(num_embeddings, 128)
    emb_p = emb.astype(jnp.float32)
    if k_pad != num_embeddings:
        emb_p = jnp.pad(emb_p, ((0, k_pad - num_embeddings), (0, 0)))
    e2 = jnp.sum(emb_p * emb_p, axis=1)
    if k_pad != num_embeddings:
        # Padded codebook columns can never win the argmin.
        e2 = e2.at[num_embeddings:].set(1e30)

    inv_std = 1.0 / jnp.sqrt(1.0 + BN_EPS)            # BN1 / BN2 in eval mode
    w1f = w1.astype(jnp.float32)
    b1f = b1.astype(jnp.float32)
    w2f = w2.astype(jnp.float32)
    b2f = b2.astype(jnp.float32)

    # Fused small matrices (computed once in XLA, resident across grid steps).
    w_dist = (-2.0 * inv_std) * (w1f @ emb_p.T)               # [D_in, K_pad]
    c_dist = (e2 - 2.0 * (b1f @ emb_p.T)).reshape(1, k_pad)   # [1, K_pad]
    w_dec = inv_std * (emb_p @ w2f)                           # [K_pad, D_in]
    b2_row = b2f.reshape(1, input_dim)                        # [1, D_in]

    # --- VMEM budget from the actual tile footprint (fits v7x's 64 MiB) ------
    est = 4 * (4 * tn * input_dim            # x + quant, double-buffered
               + 5 * tn * k_pad              # dist/enc/iota temporaries headroom
               + 4 * input_dim * k_pad       # W_dist + W_dec, double-buffered
               + 4 * (k_pad + 128))
    vmem_limit = int(min(64 * 1024 * 1024, max(16 * 1024 * 1024, 2 * est)))

    grid_spec = pltpu.PrefetchScalarGridSpec(
        num_scalar_prefetch=0,
        grid=(grid_n,),
        in_specs=[
            pl.BlockSpec((tn, input_dim), lambda i: (i, 0)),           # x tile
            pl.BlockSpec((input_dim, k_pad), lambda i: (0, 0)),        # W_dist
            pl.BlockSpec((1, k_pad), lambda i: (0, 0)),                # c_dist
            pl.BlockSpec((k_pad, input_dim), lambda i: (0, 0)),        # W_dec
            pl.BlockSpec((1, input_dim), lambda i: (0, 0)),            # b2
        ],
        out_specs=(
            pl.BlockSpec((tn, input_dim), lambda i: (i, 0)),           # quantized
            pl.BlockSpec((1, 1, k_pad + 128), lambda i: (i, 0, 0)),    # usage+SE partials
        ),
    )

    quant_flat, parts = pl.pallas_call(
        functools.partial(_vq_kernel, n_valid=n, tile_n=tn, k_pad=k_pad),
        grid_spec=grid_spec,
        out_shape=(
            jax.ShapeDtypeStruct((n_pad, input_dim), jnp.float32),
            jax.ShapeDtypeStruct((grid_n, 1, k_pad + 128), jnp.float32),
        ),
        compiler_params=pltpu.CompilerParams(
            dimension_semantics=("parallel",),
            vmem_limit_bytes=vmem_limit,
        ),
    )(flat, w_dist, c_dist, w_dec, b2_row)

    # --- wrapper-side reductions over the partial tiles ----------------------
    usage = jnp.sum(parts[:, 0, :num_embeddings], axis=0) / float(n)
    sse = jnp.sum(parts[:, 0, k_pad])
    mse = sse / float(n * input_dim)
    # q_latent + commitment * e_latent (identical forward values).
    loss = (1.0 + commitment_cost) * mse

    quantized = quant_flat[:n].reshape(input_shape)
    return loss, quantized, usage, emb


def init_params(key, num_embeddings, input_dim, embedding_dim):
    """Deterministic synthetic init mirroring the PyTorch module's shapes."""
    k_emb, k_w1, k_b1, k_w2, k_b2 = jax.random.split(key, 5)
    emb = jax.random.uniform(
        k_emb, (num_embeddings, embedding_dim), jnp.float32,
        minval=-1.0 / num_embeddings, maxval=1.0 / num_embeddings)
    # nn.Linear(input_dim, embedding_dim): stored transposed -> [in, out]
    lim1 = 1.0 / jnp.sqrt(input_dim)
    w1 = jax.random.uniform(k_w1, (input_dim, embedding_dim), jnp.float32,
                            minval=-lim1, maxval=lim1)
    b1 = jax.random.uniform(k_b1, (embedding_dim,), jnp.float32,
                            minval=-lim1, maxval=lim1)
    # nn.Linear(embedding_dim, input_dim): stored transposed -> [in, out]
    lim2 = 1.0 / jnp.sqrt(embedding_dim)
    w2 = jax.random.uniform(k_w2, (embedding_dim, input_dim), jnp.float32,
                            minval=-lim2, maxval=lim2)
    b2 = jax.random.uniform(k_b2, (input_dim,), jnp.float32,
                            minval=-lim2, maxval=lim2)
    return emb, w1, b1, w2, b2


if __name__ == "__main__":
    num_embeddings = 64
    input_dim = 32
    embedding_dim = 16
    commitment_cost = 0.25

    key = jax.random.PRNGKey(0)
    k_params, k_x = jax.random.split(key)
    params = init_params(k_params, num_embeddings, input_dim, embedding_dim)

    # inputs: [batch=2, seq=8, input_dim=32]  ->  N = 16 rows
    x = jax.random.normal(k_x, (2, 8, input_dim), jnp.float32)

    # Default tile_n; the grid_n >= 2 cap gives tn=8 -> 2 pipelined grid steps.
    loss, quantized, usage, codebook = vector_quantizer_forward(
        x, params, commitment_cost=commitment_cost)
    jax.block_until_ready((loss, quantized, usage, codebook))

    assert quantized.shape == x.shape
    assert usage.shape == (num_embeddings,)
    assert codebook.shape == (num_embeddings, embedding_dim)
    assert jnp.isfinite(loss)
    assert jnp.isclose(jnp.sum(usage), 1.0, atol=1e-5)
    print("KERNEL_OK")
</pallas_src>

<mosaic_0001>
module attributes {stable_mosaic.version = 11 : i64} {
  func.func @_vq_kernel(%arg0: i32, %arg1: memref<8x32xf32, #tpu.memory_space<vmem>>, %arg2: memref<32x128xf32, #tpu.memory_space<vmem>>, %arg3: memref<1x128xf32, #tpu.memory_space<vmem>>, %arg4: memref<128x32xf32, #tpu.memory_space<vmem>>, %arg5: memref<1x32xf32, #tpu.memory_space<vmem>>, %arg6: memref<8x32xf32, #tpu.memory_space<vmem>>, %arg7: memref<1x1x256xf32, #tpu.memory_space<vmem>>) attributes {dimension_semantics = [#tpu.dimension_semantics<parallel>], iteration_bounds = array<i64: 2>, scalar_prefetch = 0 : i64, scratch_operands = 0 : i64, tpu.core_type = #tpu.core_type<tc>, window_params = [{transform_indices = @transform_0, window_bounds = array<i64: 8, 32>}, {pipeline_mode = #tpu.pipeline_mode<synchronous>, transform_indices = @transform_1, window_bounds = array<i64: 32, 128>}, {pipeline_mode = #tpu.pipeline_mode<synchronous>, transform_indices = @transform_2, window_bounds = array<i64: 1, 128>}, {pipeline_mode = #tpu.pipeline_mode<synchronous>, transform_indices = @transform_3, window_bounds = array<i64: 128, 32>}, {pipeline_mode = #tpu.pipeline_mode<synchronous>, transform_indices = @transform_4, window_bounds = array<i64: 1, 32>}, {transform_indices = @transform_5, window_bounds = array<i64: 8, 32>}, {transform_indices = @transform_6, window_bounds = array<i64: 1, 1, 256>}]} {
    %c0 = arith.constant 0 : index
    %c0_0 = arith.constant 0 : index
    %0 = vector.load %arg1[%c0, %c0_0] : memref<8x32xf32, #tpu.memory_space<vmem>>, vector<8x32xf32>
    %c0_1 = arith.constant 0 : index
    %c0_2 = arith.constant 0 : index
    %1 = vector.load %arg2[%c0_1, %c0_2] : memref<32x128xf32, #tpu.memory_space<vmem>>, vector<32x128xf32>
    %cst = arith.constant dense<0.000000e+00> : vector<8x128xf32>
    %2 = tpu.matmul %0, %1, %cst {dimension_numbers = #tpu.dot_dimension_numbers<[1], [0], [0], [1], [0, 0, 1, 1], [], []>} : vector<8x32xf32>, vector<32x128xf32>, vector<8x128xf32> -> vector<8x128xf32>
    %c0_3 = arith.constant 0 : index
    %c0_4 = arith.constant 0 : index
    %3 = vector.load %arg3[%c0_3, %c0_4] : memref<1x128xf32, #tpu.memory_space<vmem>>, vector<1x128xf32>
    %4 = vector.broadcast %3 : vector<1x128xf32> to vector<8x128xf32>
    %5 = arith.addf %2, %4 : vector<8x128xf32>
    %6 = tpu.iota {dimensions = array<i32: 1>} : vector<8x128xi32>
    %cst_5 = arith.constant dense<0x7F800000> : vector<8xf32>
    %7 = vector.multi_reduction <minimumf>, %5, %cst_5 [1] : vector<8x128xf32> to vector<8xf32>
    %8 = vector.shape_cast %7 : vector<8xf32> to vector<8x1xf32>
    %9 = vector.broadcast %8 : vector<8x1xf32> to vector<8x128xf32>
    %10 = arith.cmpf oeq, %5, %9 : vector<8x128xf32>
    %c128_i32 = arith.constant 128 : i32
    %11 = vector.broadcast %c128_i32 : i32 to vector<8x128xi32>
    %12 = arith.select %10, %6, %11 : vector<8x128xi1>, vector<8x128xi32>
    %cst_6 = arith.constant dense<2147483647> : vector<8xi32>
    %13 = vector.multi_reduction <minsi>, %12, %cst_6 [1] : vector<8x128xi32> to vector<8xi32>
    %14 = vector.shape_cast %13 : vector<8xi32> to vector<8x1xi32>
    %15 = vector.broadcast %14 : vector<8x1xi32> to vector<8x128xi32>
    %16 = arith.cmpi eq, %6, %15 : vector<8x128xi32>
    %17 = arith.extui %16 : vector<8x128xi1> to vector<8x128xi32>
    %18 = arith.sitofp %17 : vector<8x128xi32> to vector<8x128xf32>
    %c0_7 = arith.constant 0 : index
    %c0_8 = arith.constant 0 : index
    %19 = vector.load %arg4[%c0_7, %c0_8] : memref<128x32xf32, #tpu.memory_space<vmem>>, vector<128x32xf32>
    %cst_9 = arith.constant dense<0.000000e+00> : vector<8x32xf32>
    %20 = tpu.matmul %18, %19, %cst_9 {dimension_numbers = #tpu.dot_dimension_numbers<[1], [0], [0], [1], [0, 0, 1, 1], [], []>} : vector<8x128xf32>, vector<128x32xf32>, vector<8x32xf32> -> vector<8x32xf32>
    %c0_10 = arith.constant 0 : index
    %c0_11 = arith.constant 0 : index
    %21 = vector.load %arg5[%c0_10, %c0_11] : memref<1x32xf32, #tpu.memory_space<vmem>>, vector<1x32xf32>
    %22 = vector.broadcast %21 : vector<1x32xf32> to vector<8x32xf32>
    %23 = arith.addf %20, %22 : vector<8x32xf32>
    %c0_12 = arith.constant 0 : index
    %c0_13 = arith.constant 0 : index
    %24 = vector.load %arg6[%c0_12, %c0_13] : memref<8x32xf32, #tpu.memory_space<vmem>>, vector<8x32xf32>
    tpu.vector_store %arg6[%c0_12, %c0_13], %23 {strides = array<i32>} : memref<8x32xf32, #tpu.memory_space<vmem>>, vector<8x32xf32>,
    %c8_i32 = arith.constant 8 : i32
    %25 = arith.muli %arg0, %c8_i32 : i32
    %26 = tpu.iota {dimensions = array<i32: 0>} : vector<8x1xi32>
    %27 = vector.broadcast %25 : i32 to vector<8x1xi32>
    %28 = arith.addi %27, %26 : vector<8x1xi32>
    %c16_i32 = arith.constant 16 : i32
    %29 = vector.broadcast %c16_i32 : i32 to vector<8x1xi32>
    %30 = arith.cmpi slt, %28, %29 : vector<8x1xi32>
    %31 = arith.extui %30 : vector<8x1xi1> to vector<8x1xi32>
    %32 = arith.sitofp %31 : vector<8x1xi32> to vector<8x1xf32>
    %33 = vector.broadcast %32 : vector<8x1xf32> to vector<8x128xf32>
    %34 = arith.mulf %18, %33 : vector<8x128xf32>
    %cst_14 = arith.constant dense<0.000000e+00> : vector<128xf32>
    %35 = vector.multi_reduction <add>, %34, %cst_14 [0] : vector<8x128xf32> to vector<128xf32>
    %36 = vector.shape_cast %35 : vector<128xf32> to vector<1x128xf32>
    %37 = arith.subf %23, %0 : vector<8x32xf32>
    %38 = arith.mulf %37, %37 : vector<8x32xf32>
    %39 = vector.broadcast %32 : vector<8x1xf32> to vector<8x32xf32>
    %40 = arith.mulf %38, %39 : vector<8x32xf32>
    %cst_15 = arith.constant dense<0.000000e+00> : vector<8xf32>
    %41 = vector.multi_reduction <add>, %40, %cst_15 [1] : vector<8x32xf32> to vector<8xf32>
    %42 = vector.shape_cast %41 : vector<8xf32> to vector<8x1xf32>
    %cst_16 = arith.constant dense<0.000000e+00> : vector<1xf32>
    %43 = vector.multi_reduction <add>, %42, %cst_16 [0] : vector<8x1xf32> to vector<1xf32>
    %44 = vector.shape_cast %43 : vector<1xf32> to vector<1x1xf32>
    %45 = tpu.iota {dimensions = array<i32: 1>} : vector<1x128xi32>
    %c0_i32 = arith.constant 0 : i32
    %46 = vector.broadcast %c0_i32 : i32 to vector<1x128xi32>
    %47 = arith.cmpi eq, %45, %46 : vector<1x128xi32>
    %cst_17 = arith.constant 0.000000e+00 : f32
    %48 = vector.shape_cast %44 : vector<1x1xf32> to vector<1x1xf32>
    %49 = vector.broadcast %48 : vector<1x1xf32> to vector<1x128xf32>
    %50 = vector.broadcast %cst_17 : f32 to vector<1x128xf32>
    %51 = arith.select %47, %49, %50 : vector<1x128xi1>, vector<1x128xf32>
    %52 = tpu.concatenate %36, %51 in 1 : vector<1x128xf32>, vector<1x128xf32> -> vector<1x256xf32>
    %53 = vector.shape_cast %52 : vector<1x256xf32> to vector<1x1x256xf32>
    %c0_18 = arith.constant 0 : index
    %c0_19 = arith.constant 0 : index
    %c0_20 = arith.constant 0 : index
    %54 = vector.load %arg7[%c0_18, %c0_19, %c0_20] : memref<1x1x256xf32, #tpu.memory_space<vmem>>, vector<1x1x256xf32>
    tpu.vector_store %arg7[%c0_18, %c0_19, %c0_20], %53 {strides = array<i32>} : memref<1x1x256xf32, #tpu.memory_space<vmem>>, vector<1x1x256xf32>,
    return
  }
  func.func @transform_0(%arg0: i32) -> (i32, i32) {
    %c0_i32 = arith.constant 0 : i32
    %c0_i32_0 = arith.constant 0 : i32
    return %arg0, %c0_i32 : i32, i32
  }
  func.func @transform_1(%arg0: i32) -> (i32, i32) {
    %c0_i32 = arith.constant 0 : i32
    %c0_i32_0 = arith.constant 0 : i32
    %c0_i32_1 = arith.constant 0 : i32
    return %c0_i32, %c0_i32_0 : i32, i32
  }
  func.func @transform_2(%arg0: i32) -> (i32, i32) {
    %c0_i32 = arith.constant 0 : i32
    %c0_i32_0 = arith.constant 0 : i32
    %c0_i32_1 = arith.constant 0 : i32
    return %c0_i32, %c0_i32_0 : i32, i32
  }
  func.func @transform_3(%arg0: i32) -> (i32, i32) {
    %c0_i32 = arith.constant 0 : i32
    %c0_i32_0 = arith.constant 0 : i32
    %c0_i32_1 = arith.constant 0 : i32
    return %c0_i32, %c0_i32_0 : i32, i32
  }
  func.func @transform_4(%arg0: i32) -> (i32, i32) {
    %c0_i32 = arith.constant 0 : i32
    %c0_i32_0 = arith.constant 0 : i32
    %c0_i32_1 = arith.constant 0 : i32
    return %c0_i32, %c0_i32_0 : i32, i32
  }
  func.func @transform_5(%arg0: i32) -> (i32, i32) {
    %c0_i32 = arith.constant 0 : i32
    %c0_i32_0 = arith.constant 0 : i32
    return %arg0, %c0_i32 : i32, i32
  }
  func.func @transform_6(%arg0: i32) -> (i32, i32, i32) {
    %c0_i32 = arith.constant 0 : i32
    %c0_i32_0 = arith.constant 0 : i32
    %c0_i32_1 = arith.constant 0 : i32
    return %arg0, %c0_i32, %c0_i32_0 : i32, i32, i32
  }
}

</mosaic_0001>

<bundles_post_ra>
// kernel: tpu_custom_call.1
= control target key start
LH: loop header
LB: loop body
LE: loop exit
PB: predicated region body
PF: predicated region fallthrough
CT: control target
= control target key end

     0   :  { %12 = vsyncpa [#allocation3], 0  ;;  %s1177_s0 = inlined_call_operand.vmem [shape: f32[16,32], index: 0, kind: input, shape index: {}]   ;;  %s1178_s1 = inlined_call_operand.vmem [shape: f32[32,128], index: 1, kind: input, shape index: {}]   ;;  %s1179_s2 = inlined_call_operand.vmem [shape: f32[1,128], index: 2, kind: input, shape index: {}]   ;;  %s1180_s3 = inlined_call_operand.vmem [shape: f32[128,32], index: 3, kind: input, shape index: {}]   ;;  %s1181_s4 = inlined_call_operand.vmem [shape: f32[1,32], index: 4, kind: input, shape index: {}]   ;;  %s1182_s5 = inlined_call_operand.hbm [shape: f32[16,32], index: 5, kind: output, shape index: {0}]   ;;  %s1183_s6 = inlined_call_operand.hbm [shape: f32[2,1,256], index: 6, kind: output, shape index: {1}]  }
   0x1   :  { %14 = vsyncpa [#allocation3 + $0x1], 0 }
   0x2   :  { %15 = vsyncpa [#allocation5], 0 }
   0x3   :  { %17 = vsyncpa [#allocation5 + $0x1], 0  ;;  %s944_s21 = smov 0   ;;  %s946_s22 = smov 0  }
   0x4   :  { %s948_s23 = smov 0   ;;  %s950_s24 = smov 0  }
   0x5 LB: > { %s965_s25 = sadd.s32 4294967295, %s900_s24   ;;  %s637_s26 = sadd.s32 4294967294, %s900_s24   ;;  %s900_s24 = sphi %s950_s24, %s1189_s24   ;;  %s896_s23 = sphi %s948_s23, %s1188_s23   ;;  %s892_s22 = sphi %s946_s22, %s1187_s22   ;;  %s888_s21 = sphi %s944_s21, %s1186_s21  }
   0x6   : > { %s969_s27 = sadd.s32 1, %s900_s24   ;;  %s140_s28 = sadd.s32 1, %s896_s23 }
   0x7   : > { %s137_s29 = ssub.s32 %s900_s24, %s969_s27  ;;  %p150_p0 = scmp.ne.s32.totalorder %s896_s23, %s892_s22 }
   0x8   : > { %p138_p1 = scmp.eq.s32.totalorder %s137_s29, 0  ;;  %p151_p2 = scmp.eq.s32.totalorder %s965_s25, 1 }
   0x9   : > { %p156_p3 = scmp.ne.s32.totalorder %s892_s22, %s888_s21  ;;  %p157_p4 = scmp.eq.s32.totalorder %s637_s26, 1 }
   0xa   : > { %s980_s30 = scalar_select %p138_p1, %s896_s23, %s140_s28  }
   0xb   : > { %p982_p5 = por %p151_p2, %p150_p0  ;;  %p986_p6 = por %p157_p4, %p156_p3 }
   0xc   : > { %p640_p7 = scmp.ge.s32.totalorder %s900_s24, 1  ;;  %p220_p8 = scmp.lt.s32.totalorder %s900_s24, 3 }
   0xe   : > { %p221_p9 = pnand %p640_p7, %p220_p8 }
   0xf   : > { %v259_v0 = vld [vmem:[%s1178_s1] sm:$0xff] (!%p221_p9)  ;;  %v260_v1 = vld [vmem:[%s1178_s1 + $0x8] sm:$0xff] (!%p221_p9)  ;;  %v261_v2 = vld [vmem:[%s1178_s1 + $0x10] sm:$0xff] (!%p221_p9)  ;;  %v902_v3 = vmov (!%p221_p9), 0.0|0.0   ;;  %vm903_vm0 = vmmov (!%p221_p9), 0   ;;  %v904_v6 = vmov (!%p221_p9), 0.0   ;;  %v344_v13 = vlaneseq (!%p221_p9) }
  0x10   : > { %224 = sbr.rel (%p221_p9) target bundleno = 1077 (0x435), region = 40  ;;  %727 = vmatprep.subr.bf16.mxu0 (!%p221_p9), %v902_v3  ;;  %v728_v4 = vpack.c.bf16 (!%p221_p9), %v260_v1, %v259_v0  ;;  %v262_v5 = vld [vmem:[%s1178_s1 + $0x18] sm:$0xff] (!%p221_p9)  ;;  %689 = vmatprep.mubr.msk.f32.mxu0 (!%p221_p9), %vm903_vm0, %v904_v6  ;;  %p254_p10 = scmp.lt.s32.totalorder (!%p221_p9), %s965_s25, 1  ;;  %vm270_vm1 = vcmask (!%p221_p9), 261120   ;;  %v644_v9 = vld [vmem:[%s1179_s2] ss:$0 sm:$0xff] (!%p221_p9) }
  0x11   : > { %733 = vmatprep.subr.bf16.mxu1 (!%p221_p9), %v902_v3  ;;  %724 = vmatprep.mubr.msk.f32.mxu1 (!%p221_p9), %vm903_vm0, %v904_v6  ;;  %v731_v7 = vpack.c.bf16 (!%p221_p9), %v262_v5, %v261_v2  ;;  %v1022_v14 = vand.u32 (!%p221_p9), 127, %v344_v13  ;;  %v367_v19 = vld [vmem:[%s1180_s3] sm:$0xff] (!%p221_p9)  ;;  %v368_v20 = vld [vmem:[%s1180_s3 + $0x8] sm:$0xff] (!%p221_p9)  ;;  %v369_v21 = vld [vmem:[%s1180_s3 + $0x10] sm:$0xff] (!%p221_p9)  ;;  %v905_v52 = vmov (!%p221_p9), 1.0   ;;  %s649_s11 = sshll.u32 (!%p221_p9), %s965_s25, 3 }
  0x12   : > { %729 = vmatpush3.bf16.msra.mxu0 (!%p221_p9), %v728_v4  ;;  %v734_v22 = vpack.c.bf16 (!%p221_p9), %v368_v20, %v367_v19  ;;  %v370_v23 = vld [vmem:[%s1180_s3 + $0x18] sm:$0xff] (!%p221_p9)  ;;  %v371_v25 = vld [vmem:[%s1180_s3 + $0x20] sm:$0xff] (!%p221_p9)  ;;  %v372_v26 = vld [vmem:[%s1180_s3 + $0x28] sm:$0xff] (!%p221_p9)  ;;  %s1085_s12 = sand.u32 (!%p221_p9), 1, %s892_s22   ;;  %v1088_v53 = vshrl.u32 (!%p221_p9), %v344_v13, 7  ;;  %v464_v54 = vstv (!%p221_p9), %s649_s11  ;;  %s906_s9 = smov (!%p221_p9), [#allocation2]  }
  0x13   : > { %730 = vmatprep.subr.bf16.mxu0 (!%p221_p9), %v902_v3  ;;  %v737_v24 = vpack.c.bf16 (!%p221_p9), %v370_v23, %v369_v21  ;;  %v740_v27 = vpack.c.bf16 (!%p221_p9), %v372_v26, %v371_v25  ;;  %v373_v28 = vld [vmem:[%s1180_s3 + $0x30] sm:$0xff] (!%p221_p9)  ;;  %v374_v29 = vld [vmem:[%s1180_s3 + $0x38] sm:$0xff] (!%p221_p9)  ;;  %v375_v31 = vld [vmem:[%s1180_s3 + $0x40] sm:$0xff] (!%p221_p9)  ;;  %s641_s13 = sshll.u32 (!%p221_p9), %s1085_s12, 3  ;;  %s514_s28 = scalar_lea.sflag (!%p221_p9), [#allocation3], %s1085_s12 }
  0x14   : > { %735 = vmatpush3.bf16.msra.mxu1 (!%p221_p9), %v734_v22  ;;  %v743_v30 = vpack.c.bf16 (!%p221_p9), %v374_v29, %v373_v28  ;;  %v376_v32 = vld [vmem:[%s1180_s3 + $0x48] sm:$0xff] (!%p221_p9)  ;;  %v377_v34 = vld [vmem:[%s1180_s3 + $0x50] sm:$0xff] (!%p221_p9)  ;;  %v378_v35 = vld [vmem:[%s1180_s3 + $0x58] sm:$0xff] (!%p221_p9)  ;;  %v465_v56 = vadd.s32 (!%p221_p9), %v464_v54, %v1088_v53  ;;  %s246_s16 = scalar_lea.vmem (!%p221_p9), [#allocation2], %s641_s13  ;;  %s810_s10 = sshll.u32 (!%p221_p9), %s906_s9, 4  ;;  %s811_s10 = int_to_ptr.vmem [resolvable:$false] %s810_s10 }
  0x15   : > { %736 = vmatprep.subr.bf16.mxu1 (!%p221_p9), %v902_v3  ;;  %v746_v33 = vpack.c.bf16 (!%p221_p9), %v376_v32, %v375_v31  ;;  %v749_v36 = vpack.c.bf16 (!%p221_p9), %v378_v35, %v377_v34  ;;  %v379_v37 = vld [vmem:[%s1180_s3 + $0x60] sm:$0xff] (!%p221_p9)  ;;  %v380_v38 = vld [vmem:[%s1180_s3 + $0x68] sm:$0xff] (!%p221_p9)  ;;  %v381_v44 = vld [vmem:[%s1180_s3 + $0x70] sm:$0xff] (!%p221_p9)  ;;  %s812_s11 = scalar_lea.vmem (!%p221_p9), %s811_s10, 256 }
  0x16   : > { %732 = vmatpush3.bf16.msra.mxu0 (!%p221_p9), %v731_v7  ;;  %v752_v39 = vpack.c.bf16 (!%p221_p9), %v380_v38, %v379_v37  ;;  %v382_v45 = vld [vmem:[%s1180_s3 + $0x78] sm:$0xff] (!%p221_p9)  ;;  %v647_v55 = vld [vmem:[%s1181_s4] ss:$0 sm:$0xff] (!%p221_p9)  ;;  %vm466_vm5 = vcmp.lt.s32.totalorder (!%p221_p9), %v465_v56, 16 }
  0x17   : > { %s255_s17 = scalar_select %p254_p10, %s965_s25, 1  ;;  %v755_v46 = vpack.c.bf16 %v382_v45, %v381_v44  ;;  %v650_v62 = vsel %vm466_vm5, 1.0, %v904_v6 }
  0x18   : > { %738 = vmatpush3.bf16.msra.mxu1 %v737_v24 }
  0x19   : > { %s643_s18 = sshll.u32 %s255_s17, 3  ;;  %739 = vmatprep.subr.bf16.mxu1 %v902_v3  ;;  %s653_s17 = sshll.u32 %s965_s25, 7 }
  0x1a   : > { %s257_s26 = scalar_lea.vmem %s1177_s0, %s643_s18  ;;  %s1103_s20 = scalar_lea.hbm %s1182_s5, %s653_s17 }
  0x1b   : > { %v1014_v8 = vld [vmem:[%s257_s26] sm:$0xff]  ;;  %s532_s26 = sshll.u32 %s246_s16, 4  ;;  %s533_s26 = int_to_ptr.vmem [resolvable:$true] %s532_s26 }
  0x1c   : > { %690 = vmatmul.mubr.msk.f32.vlgmr.msra.gmra.mrb[0].mxu0 %vm270_vm1, %v1014_v8  ;;  %741 = vmatpush3.bf16.msra.mxu1 %v740_v27  ;;  %s806_s29 = scalar_lea.vmem %s533_s26, 128  ;;  %p813_p0 = scmp.lt.s32.totalorder %s533_s26, %s811_s10 }
  0x1d   : > { %742 = vmatprep.subr.bf16.mxu1 %v902_v3  ;;  %p807_p11 = scmp.ne.s32.totalorder %s533_s26, %s806_s29  ;;  %p814_p1 = scmp.lt.s32.totalorder %s812_s11, %s806_s29 }
  0x1f   : > { %p808_p12 = pnand %p807_p11, %p982_p5  ;;  %p815_p2 = por %p814_p1, %p813_p0 }
  0x20   : > { %744 = vmatpush3.bf16.msra.mxu1 %v743_v30 }
  0x21   : > { %745 = vmatprep.subr.bf16.mxu1 %v902_v3  ;;  %p809_p13 = pneg %p808_p12 }
  0x23   : > { %p816_p3 = pnand %p815_p2, %p809_p13 }
  0x24   : > { %747 = vmatpush3.bf16.msra.mxu1 %v746_v33 }
  0x25   : > { %748 = vmatprep.subr.bf16.mxu1 %v902_v3 }
  0x28   : > { %750 = vmatpush3.bf16.msra.mxu1 %v749_v36 }
  0x29   : > { %751 = vmatprep.subr.bf16.mxu1 %v902_v3 }
  0x2c   : > { %753 = vmatpush3.bf16.msra.mxu1 %v752_v39 }
  0x2d   : > { %754 = vmatprep.subr.bf16.mxu1 %v902_v3 }
  0x30   : > { %756 = vmatpush3.bf16.msra.mxu1 %v755_v46 }
  0xef   : > { %v340_v10 = vpop.f32.mrb[0].mxu0 }
  0xf0   : > { %v341_v11 = vadd.f32 %v644_v9, %v340_v10  ;;  %v691_v12 = vpop.f32.mrb[1].mxu0 }
  0xf2   : > { %346 = vmin.xlane.f32.xlu0 %v341_v11 }
 0x17f   : > { %v347_v15 = vpop.xlane.xlu0 %346 }
 0x180   : > { %vm348_vm2 = vcmp.eq.f32.partialorder %v341_v11, %v347_v15 }
 0x181   : > { %v349_v16 = vsel %vm348_vm2, %v1022_v14, 128 }
 0x182   : > { %v351_v17 = vshra.s32 %v349_v16, 16  ;;  %v350_v40 = vand.u32 65535, %v349_v16 }
 0x184   : > { %v353_v18 = vcvt.s32.f32 %v351_v17  ;;  %v352_v42 = vcvt.s32.f32 %v350_v40 }
 0x186   : > { %354 = vmin.xlane.f32.xlu0 %v353_v18 }
 0x213   : > { %v355_v41 = vpop.xlane.xlu0 %354 }
 0x214   : > { %vm356_vm3 = vcmp.eq.f32.partialorder %v353_v18, %v355_v41  ;;  %v361_v47 = vcvt.f32.s32 %v355_v41 }
 0x215   : > { %v357_v43 = vsel %vm356_vm3, %v352_v42, inf }
 0x216   : > { %358 = vmin.xlane.f32.xlu1 %v357_v43  ;;  %v362_v49 = vshll.u32 %v361_v47, 16 }
 0x2a3   : > { %v359_v48 = vpop.xlane.xlu1 %358 }
 0x2a4   : > { %v360_v50 = vcvt.f32.s32 %v359_v48 }
 0x2a6   : > { %v363_v51 = vadd.s32 %v362_v49, %v360_v50 }
 0x2a8   : > { %vm364_vm4 = vcmp.eq.s32.totalorder %v1022_v14, %v363_v51 }
 0x2a9   : > { %725 = vmatmul.mubr.msk.f32.vlgmr.msra.gmra.mrb[0].mxu1 %vm364_vm4, %v905_v52 }
 0x37c   : > { %v456_v57 = vpop.f32.mrb[0].mxu1 }
 0x37d   : > { %v457_v58 = vadd.f32 %v647_v55, %v456_v57  ;;  %v726_v59 = vpop.f32.mrb[1].mxu1 }
 0x37f   : > { %v476_v60 = vsub.f32 %v457_v58, %v1014_v8  ;;  %460 = vst.msk [vmem:[%s246_s16] sm:$0xff] %vm270_vm1, %v457_v58 }
 0x381   : > { %v477_v61 = vmul.f32 %v476_v60, %v476_v60 }
 0x383   : > { %v478_v63 = vmul.f32 %v650_v62, %v477_v61 }
 0x385   : > { %v479_v0 = vsel %vm270_vm1, %v478_v63, 0.0 }
 0x386   : > { %480 = vadd.xlane.f32.xlu1 %v479_v0 }
 0x387   : > { %819 = shalt.err (!%p816_p3)
}
 0x388   : > { %s820_s13 = scalar_lea.hbm %s1103_s20, 128  ;;  %s824_s16 = scalar_lea.hbm %s1182_s5, 256 }
 0x389   : > { %p821_p4 = scmp.ne.s32.totalorder %s1103_s20, %s820_s13  ;;  %p825_p9 = scmp.lt.u32.totalorder %s1103_s20, %s1182_s5 }
 0x38a   : > { %p826_p10 = scmp.lt.u32.totalorder %s824_s16, %s820_s13  ;;  %p828_p12 = scmp.lt.u32.totalorder %s820_s13, %s1103_s20 }
 0x38b   : > { %p822_p7 = pnand %p821_p4, %p982_p5 }
 0x38c   : > { %p827_p11 = por %p826_p10, %p825_p9 }
 0x38d   : > { %p823_p8 = pneg %p822_p7 }
 0x38e   : > { %p829_p13 = por %p828_p12, %p827_p11 }
 0x390   : > { %p830_p0 = pnand %p829_p13, %p823_p8 }
 0x392   : > { %833 = shalt.err (!%p830_p0)
}
 0x393   : > { %757 = dma.vmem_to_hbm [thread:$0]  (%p982_p5), %s533_s26, 128, %s1103_s20, %s514_s28   ;;  %v646_v1 = vsel %vm364_vm4, 1.0, %v904_v6  ;;  %v907_v10 = vmov 1966171168   ;;  %vm488_vm6 = vcmp.eq.s32.totalorder %v1022_v14, 0  ;;  %vm510_vm7 = vcmp.lt.s32.totalorder %v344_v13, 256 }
 0x394   : > { %v469_v2 = vmul.f32 %v650_v62, %v646_v1  ;;  %v494_v11 = vunpack.c.l.s4 %v907_v10  ;;  %s642_s19 = sshll.u32 %s1085_s12, 1  ;;  %s658_s20 = sshll.u32 %s965_s25, 5 }
 0x395   : > { %s253_s26 = scalar_lea.vmem [#allocation4], %s642_s19  ;;  %s1134_s10 = scalar_lea.hbm %s1183_s6, %s658_s20 }
 0x396   : > { %v470_v3 = vrot.slane %v469_v2, 4  ;;  %v495_v17 = vunpack.c.0.s8 %v494_v11  ;;  %s546_s28 = sshll.u32 %s253_s26, 4  ;;  %s519_s11 = scalar_lea.sflag [#allocation5], %s1085_s12  ;;  %s1136_s28 = int_to_ptr.vmem [resolvable:$true] %s546_s28 }
 0x397   : > { %s834_s13 = scalar_lea.vmem %s1136_s28, 32  ;;  %s908_s25 = smov [#allocation4]  }
 0x398   : > { %v471_v4 = vadd.f32 %v470_v3, %v469_v2  ;;  %v498_v20 = vsub.s32 %v495_v17, %v1088_v53  ;;  %p835_p1 = scmp.ne.s32.totalorder %s1136_s28, %s834_s13  ;;  %s838_s14 = sshll.u32 %s908_s25, 4  ;;  %s839_s14 = int_to_ptr.vmem [resolvable:$false] %s838_s14 }
 0x399   : > { %s840_s15 = scalar_lea.vmem %s839_s14, 64  ;;  %p841_p4 = scmp.lt.s32.totalorder %s1136_s28, %s839_s14 }
 0x39a   : > { %v472_v5 = vrot.slane %v471_v4, 2  ;;  %p836_p2 = pnand %p835_p1, %p982_p5  ;;  %p842_p7 = scmp.lt.s32.totalorder %s840_s15, %s834_s13 }
 0x39c   : > { %v473_v12 = vadd.f32 %v472_v5, %v471_v4  ;;  %p837_p3 = pneg %p836_p2  ;;  %p843_p8 = por %p842_p7, %p841_p4 }
 0x39e   : > { %v474_v18 = vrot.slane %v473_v12, 1  ;;  %p844_p9 = pnand %p843_p8, %p837_p3 }
 0x3a0   : > { %v475_v21 = vadd.f32 %v474_v18, %v473_v12 }
 0x413   : > { %v481_v7 = vpop.xlane.xlu1 %480 }
 0x414   : > { %v482_v8 = vrot.slane %v481_v7, 4 }
 0x416   : > { %v483_v9 = vadd.f32 %v482_v8, %v481_v7 }
 0x418   : > { %v484_v15 = vrot.slane %v483_v9, 2 }
 0x41a   : > { %v485_v16 = vadd.f32 %v484_v15, %v483_v9 }
 0x41c   : > { %v486_v19 = vrot.slane %v485_v16, 1 }
 0x41e   : > { %v487_v6 = vadd.f32 %v486_v19, %v485_v16 }
 0x420   : > { %v489_v22 = vsel %vm488_vm6, %v487_v6, 0.0 }
 0x421   : > { %v492_v23 = vcombine.low %v475_v21, %v489_v22 }
 0x423   : > { %v499_v24 = vrot.slane %v492_v23, %v498_v20 }
 0x425   : > { %v506_v25 = vrot.slane %v499_v24, %v498_v20 }
 0x427   : > { %512 = vst.msk [vmem:[%s253_s26] sm:$0x3] %vm510_vm7, %v506_v25 }
 0x428   : > { %847 = shalt.err (!%p844_p9)
}
 0x429   : > { %s848_s12 = scalar_lea.hbm %s1134_s10, 32  ;;  %s852_s18 = scalar_lea.hbm %s1183_s6, 64 }
 0x42a   : > { %p849_p10 = scmp.ne.s32.totalorder %s1134_s10, %s848_s12  ;;  %p853_p13 = scmp.lt.u32.totalorder %s1134_s10, %s1183_s6 }
 0x42b   : > { %p854_p0 = scmp.lt.u32.totalorder %s852_s18, %s848_s12  ;;  %p856_p2 = scmp.lt.u32.totalorder %s848_s12, %s1134_s10 }
 0x42c   : > { %p850_p11 = pnand %p849_p10, %p982_p5 }
 0x42d   : > { %p855_p1 = por %p854_p0, %p853_p13 }
 0x42e   : > { %p851_p12 = pneg %p850_p11 }
 0x42f   : > { %p857_p3 = por %p856_p2, %p855_p1 }
 0x431   : > { %p858_p4 = pnand %p857_p3, %p851_p12 }
 0x433   : > { %861 = shalt.err (!%p858_p4)
}
 0x434   : > { %758 = dma.vmem_to_hbm [thread:$0]  (%p982_p5), %s1136_s28, 32, %s1134_s10, %s519_s11  }
 0x435 PF: > { %p768_p7 = scmp.ge.s32.totalorder %s900_s24, 2  ;;  %s558_s26 = sand.u32 1, %s888_s21  }
 0x436   : > { %s559_s29 = scalar_lea.sflag [#allocation3], %s558_s26 }
 0x437   : > { %p762_p8 = pnand %p768_p7, %p986_p6 }
 0x439   : > { %879 = dma.done.wait (!%p762_p8), %s559_s29, 128  }
 0x43a   : > { %881 = vsyncadd (!%p762_p8), %s559_s29, 4294967168  ;;  %s568_s9 = scalar_lea.sflag [#allocation5], %s558_s26 }
 0x43b   : > { %883 = dma.done.wait (!%p762_p8), %s568_s9, 32  }
 0x43c   : > { %885 = vsyncadd (!%p762_p8), %s568_s9, 4294967264  ;;  %p20_p5 = scmp.ge.s32.totalorder %s969_s27, 4   ;;  %s1186_s21 = smov %s892_s22 }
 0x43d   : > { %s1187_s22 = smov %s896_s23  ;;  %s1188_s23 = smov %s980_s30 }
 0x43e   : > { %s1189_s24 = smov %s969_s27  ;;  %22 = sbr.rel (!%p20_p5) target bundleno = 5 (0x5), region = 92 }
 0x445   :  { %573 = vsyncpa [#allocation3], 1 }
 0x446   :  { %575 = vsyncpa [#allocation3 + $0x1], 1 }
 0x447   :  { %576 = vsyncpa [#allocation5], 1 }
 0x448   :  { %578 = vsyncpa [#allocation5 + $0x1], 1 }

</bundles_post_ra>
